<compile_context>
chip_gen: v7x
topology: tpu7x:2x2x1
jax: 0.10.0
libtpu: 0.0.40
codegen_flags: <defaults>
</compile_context>

<pallas_src>
import jax
import jax.numpy as jnp
from jax.experimental import pallas as pl
from jax.experimental.pallas import tpu as pltpu

# ---- model config (small shapes consistent with the module) ----
VOCAB_SIZE = 50
EMBED_DIM = 32
N_FILTERS = 8
FILTER_SIZES = (3, 4, 5)
OUTPUT_DIM = 1
DROPOUT = 0.5          # inference: identity
PAD_IDX = 1
TRUNCATE_SIZE = 16     # T
FS_MAX = max(FILTER_SIZES)
MAX_BATCH_TILE = 256   # examples per grid step (256-2048 all fit VMEM comfortably)


def _round_up(x, m):
    return (x + m - 1) // m * m


def cnn_kernel(ids_ref, table_ref, wpk_ref, bpk_ref, mask_ref, fcw_ref, fcb_ref,
               out_ref):
    """BT examples per step: one-hot gather -> packed conv -> ReLU -> max-pool -> FC -> sigmoid."""
    BT, Tp = ids_ref.shape          # Tp = padded time (multiple of 8, >= T + FS_MAX - 1)
    Vp, E = table_ref.shape         # vocab (+1 zero sentinel row), embedding dim
    FSM = wpk_ref.shape[0]          # max filter size
    F3 = wpk_ref.shape[2]           # len(filter_sizes) * n_filters
    T = mask_ref.shape[0]           # true (truncated) sequence length

    # ---- embedding lookup as a one-hot matmul (gather stays on-chip, runs on the MXU) ----
    ids = ids_ref[...]                                                     # (BT, Tp) int32
    onehot = (jax.lax.broadcasted_iota(jnp.int32, (BT, Tp, Vp), 2)
              == ids[:, :, None]).astype(jnp.float32)                      # (BT, Tp, Vp)
    emb = jnp.dot(onehot.reshape(BT * Tp, Vp), table_ref[...],
                  preferred_element_type=jnp.float32).reshape(BT, Tp, E)   # (BT, Tp, E)

    # ---- packed convolution: FSM shifted matmuls, batch*time folded into the MXU M dim ----
    acc = jnp.zeros((BT * T, F3), jnp.float32)
    for dt in range(FSM):           # static & small -> unrolled MXU pushes
        win = emb[:, dt:dt + T, :].reshape(BT * T, E)
        acc = acc + jnp.dot(win, wpk_ref[dt], preferred_element_type=jnp.float32)

    conved = jnp.maximum(acc.reshape(BT, T, F3) + bpk_ref[...][None], 0.0)  # ReLU
    conved = conved * mask_ref[...][None]      # zero positions past each filter's L_out
    pooled = jnp.max(conved, axis=1)           # max_pool1d over time (sublane reduce) -> (BT, 3F)

    # TODO(synk): dropout is identity at inference time; intentionally not applied.
    # ---- Linear(3F -> 1) as VPU multiply + lane reduce, then sigmoid ----
    logits = jnp.sum(pooled * fcw_ref[...], axis=-1, keepdims=True) + fcb_ref[...]
    out_ref[...] = jax.nn.sigmoid(logits)


def cnn_truncate_forward(text, params):
    """text: (B, S) integer token ids. Returns (B, OUTPUT_DIM) float32 probabilities."""
    B, S = text.shape
    T = TRUNCATE_SIZE
    if S < T:
        pad = jnp.full((B, T - S), PAD_IDX, dtype=text.dtype)
        text = jnp.concatenate([text, pad], axis=1)
    elif S > T:
        # TODO(synk): mirrors the original PyTorch code, which (buggily) slices dim 0
        # (the batch axis) when the sequence is longer than trucate_size.
        text = text[0:T]

    B_eff, T_eff = text.shape
    E, F = EMBED_DIM, N_FILTERS
    F3 = F * len(FILTER_SIZES)

    # ---- pack / pad parameters (cheap wrapper glue; all resident in VMEM inside the kernel) ----
    sentinel = VOCAB_SIZE                                    # index of the appended zero row
    table = jnp.concatenate(
        [params["embedding"].astype(jnp.float32), jnp.zeros((1, E), jnp.float32)],
        axis=0)                                              # (V+1, E)

    wpk = jnp.zeros((FS_MAX, E, F3), jnp.float32)
    for i, fs in enumerate(FILTER_SIZES):
        wpk = wpk.at[:fs, :, i * F:(i + 1) * F].set(params[f"conv{i}_w"].astype(jnp.float32))
    bpk = jnp.concatenate([params[f"conv{i}_b"].astype(jnp.float32)
                           for i in range(len(FILTER_SIZES))], axis=1)       # (1, 3F)

    t_idx = jnp.arange(T_eff, dtype=jnp.int32)[:, None]                      # (T, 1)
    lout = jnp.concatenate([jnp.full((F,), T_eff - fs + 1, jnp.int32)
                            for fs in FILTER_SIZES])                          # (3F,)
    mask = (t_idx < lout[None, :]).astype(jnp.float32)                        # (T, 3F)

    fcw_row = params["fc_w"].astype(jnp.float32).T                            # (1, 3F)
    fcb = params["fc_b"].astype(jnp.float32)                                  # (1, 1)

    # ---- pad token ids: time up to a multiple of 8 (>= T+FS_MAX-1), batch to a tile multiple ----
    ids = text.astype(jnp.int32)
    Tp = _round_up(T_eff + FS_MAX - 1, 8)
    ids = jnp.concatenate(
        [ids, jnp.full((B_eff, Tp - T_eff), sentinel, jnp.int32)], axis=1)

    BT = min(MAX_BATCH_TILE, _round_up(B_eff, 8))
    B_pad = _round_up(B_eff, BT)
    if B_pad > B_eff:
        ids = jnp.concatenate(
            [ids, jnp.full((B_pad - B_eff, Tp), sentinel, jnp.int32)], axis=0)

    full = lambda shape: pl.BlockSpec(shape, lambda b: (0,) * len(shape))

    out = pl.pallas_call(
        cnn_kernel,
        out_shape=jax.ShapeDtypeStruct((B_pad, OUTPUT_DIM), jnp.float32),
        grid_spec=pltpu.PrefetchScalarGridSpec(
            num_scalar_prefetch=0,
            grid=(B_pad // BT,),
            in_specs=[
                pl.BlockSpec((BT, Tp), lambda b: (b, 0)),   # token ids: only per-step DMA
                full(table.shape),                          # embedding table (resident)
                full(wpk.shape), full(bpk.shape),           # packed conv weights / biases
                full(mask.shape),                           # per-position validity mask
                full(fcw_row.shape), full(fcb.shape),       # fc weight row / bias
            ],
            out_specs=pl.BlockSpec((BT, OUTPUT_DIM), lambda b: (b, 0)),
        ),
        compiler_params=pltpu.CompilerParams(dimension_semantics=("parallel",)),
    )(ids, table, wpk, bpk, mask, fcw_row, fcb)

    return out[:B_eff]


def init_params(key):
    ks = jax.random.split(key, 9)
    emb = 0.1 * jax.random.normal(ks[0], (VOCAB_SIZE, EMBED_DIM), jnp.float32)
    emb = emb.at[PAD_IDX].set(0.0)  # padding_idx row is zero, as in nn.Embedding
    params = {"embedding": emb}
    for i, fs in enumerate(FILTER_SIZES):
        params[f"conv{i}_w"] = 0.1 * jax.random.normal(
            ks[1 + 2 * i], (fs, EMBED_DIM, N_FILTERS), jnp.float32)
        params[f"conv{i}_b"] = 0.05 * jax.random.normal(
            ks[2 + 2 * i], (1, N_FILTERS), jnp.float32)
    params["fc_w"] = 0.1 * jax.random.normal(
        ks[7], (len(FILTER_SIZES) * N_FILTERS, OUTPUT_DIM), jnp.float32)
    params["fc_b"] = 0.05 * jax.random.normal(ks[8], (1, OUTPUT_DIM), jnp.float32)
    return params


def reference_forward(text, params):
    """Pure-JAX reference of the same forward pass (for a correctness check)."""
    B, S = text.shape
    T = TRUNCATE_SIZE
    if S < T:
        text = jnp.concatenate(
            [text, jnp.full((B, T - S), PAD_IDX, dtype=text.dtype)], axis=1)
    elif S > T:
        text = text[0:T]
    hp = jax.lax.Precision.HIGHEST
    emb = jnp.take(params["embedding"], text, axis=0)  # (B, T, E)
    pooled = []
    for i, fs in enumerate(FILTER_SIZES):
        w = params[f"conv{i}_w"]          # (fs, E, F)
        b = params[f"conv{i}_b"]          # (1, F)
        lout = text.shape[1] - fs + 1
        windows = jnp.stack([emb[:, dt:dt + lout, :] for dt in range(fs)], axis=2)
        conv = jnp.einsum("blde,def->blf", windows, w, precision=hp) + b[None]
        conv = jnp.maximum(conv, 0.0)
        pooled.append(jnp.max(conv, axis=1))             # (B, F)
    cat = jnp.concatenate(pooled, axis=1)
    return jax.nn.sigmoid(jnp.dot(cat, params["fc_w"], precision=hp) + params["fc_b"])


if __name__ == "__main__":
    key = jax.random.PRNGKey(0)
    pkey, tkey = jax.random.split(key)
    params = init_params(pkey)

    B, S = 2, 12  # S < TRUNCATE_SIZE -> exercises the padding branch
    text = jax.random.randint(tkey, (B, S), 0, VOCAB_SIZE, dtype=jnp.int32)

    out = cnn_truncate_forward(text, params)
    out = jax.block_until_ready(out)

    ref = reference_forward(text, params)
    assert out.shape == (B, OUTPUT_DIM)
    assert jnp.allclose(out, ref, atol=1e-4, rtol=1e-4), (out, ref)
    print("KERNEL_OK")
</pallas_src>

<mosaic_0001>
module attributes {stable_mosaic.version = 11 : i64} {
  func.func @cnn_kernel(%arg0: i32, %arg1: memref<8x24xi32, #tpu.memory_space<vmem>>, %arg2: memref<51x32xf32, #tpu.memory_space<vmem>>, %arg3: memref<5x32x24xf32, #tpu.memory_space<vmem>>, %arg4: memref<1x24xf32, #tpu.memory_space<vmem>>, %arg5: memref<16x24xf32, #tpu.memory_space<vmem>>, %arg6: memref<1x24xf32, #tpu.memory_space<vmem>>, %arg7: memref<1x1xf32, #tpu.memory_space<vmem>>, %arg8: memref<8x1xf32, #tpu.memory_space<vmem>>) attributes {dimension_semantics = [#tpu.dimension_semantics<parallel>], iteration_bounds = array<i64: 1>, scalar_prefetch = 0 : i64, scratch_operands = 0 : i64, tpu.core_type = #tpu.core_type<tc>, window_params = [{transform_indices = @transform_0, window_bounds = array<i64: 8, 24>}, {pipeline_mode = #tpu.pipeline_mode<synchronous>, transform_indices = @transform_1, window_bounds = array<i64: 51, 32>}, {pipeline_mode = #tpu.pipeline_mode<synchronous>, transform_indices = @transform_2, window_bounds = array<i64: 5, 32, 24>}, {pipeline_mode = #tpu.pipeline_mode<synchronous>, transform_indices = @transform_3, window_bounds = array<i64: 1, 24>}, {pipeline_mode = #tpu.pipeline_mode<synchronous>, transform_indices = @transform_4, window_bounds = array<i64: 16, 24>}, {pipeline_mode = #tpu.pipeline_mode<synchronous>, transform_indices = @transform_5, window_bounds = array<i64: 1, 24>}, {pipeline_mode = #tpu.pipeline_mode<synchronous>, transform_indices = @transform_6, window_bounds = array<i64: 1, 1>}, {transform_indices = @transform_7, window_bounds = array<i64: 8, 1>}]} {
    %c0 = arith.constant 0 : index
    %c0_0 = arith.constant 0 : index
    %0 = vector.load %arg1[%c0, %c0_0] : memref<8x24xi32, #tpu.memory_space<vmem>>, vector<8x24xi32>
    %1 = tpu.iota {dimensions = array<i32: 2>} : vector<8x24x51xi32>
    %2 = vector.shape_cast %0 : vector<8x24xi32> to vector<8x24x1xi32>
    %3 = vector.broadcast %2 : vector<8x24x1xi32> to vector<8x24x51xi32>
    %4 = arith.cmpi eq, %1, %3 : vector<8x24x51xi32>
    %5 = arith.extui %4 : vector<8x24x51xi1> to vector<8x24x51xi32>
    %6 = arith.sitofp %5 : vector<8x24x51xi32> to vector<8x24x51xf32>
    %7 = vector.shape_cast %6 : vector<8x24x51xf32> to vector<192x51xf32>
    %c0_1 = arith.constant 0 : index
    %c0_2 = arith.constant 0 : index
    %8 = vector.load %arg2[%c0_1, %c0_2] : memref<51x32xf32, #tpu.memory_space<vmem>>, vector<51x32xf32>
    %cst = arith.constant dense<0.000000e+00> : vector<192x32xf32>
    %9 = tpu.matmul %7, %8, %cst {dimension_numbers = #tpu.dot_dimension_numbers<[1], [0], [0], [1], [0, 0, 1, 1], [], []>} : vector<192x51xf32>, vector<51x32xf32>, vector<192x32xf32> -> vector<192x32xf32>
    %10 = vector.shape_cast %9 : vector<192x32xf32> to vector<8x24x32xf32>
    %cst_3 = arith.constant 0.000000e+00 : f32
    %11 = vector.broadcast %cst_3 : f32 to vector<128x24xf32>
    %12 = vector.extract_strided_slice %10 {offsets = [0, 0, 0], sizes = [8, 16, 32], strides = [1, 1, 1]} : vector<8x24x32xf32> to vector<8x16x32xf32>
    %13 = vector.shape_cast %12 : vector<8x16x32xf32> to vector<128x32xf32>
    %c0_4 = arith.constant 0 : index
    %c0_5 = arith.constant 0 : index
    %c0_6 = arith.constant 0 : index
    %14 = vector.load %arg3[%c0_4, %c0_5, %c0_6] : memref<5x32x24xf32, #tpu.memory_space<vmem>>, vector<1x32x24xf32>
    %15 = vector.shape_cast %14 : vector<1x32x24xf32> to vector<32x24xf32>
    %cst_7 = arith.constant dense<0.000000e+00> : vector<128x24xf32>
    %16 = tpu.matmul %13, %15, %cst_7 {dimension_numbers = #tpu.dot_dimension_numbers<[1], [0], [0], [1], [0, 0, 1, 1], [], []>} : vector<128x32xf32>, vector<32x24xf32>, vector<128x24xf32> -> vector<128x24xf32>
    %17 = arith.addf %11, %16 : vector<128x24xf32>
    %18 = vector.extract_strided_slice %10 {offsets = [0, 1, 0], sizes = [8, 16, 32], strides = [1, 1, 1]} : vector<8x24x32xf32> to vector<8x16x32xf32>
    %19 = vector.shape_cast %18 : vector<8x16x32xf32> to vector<128x32xf32>
    %c1 = arith.constant 1 : index
    %c0_8 = arith.constant 0 : index
    %c0_9 = arith.constant 0 : index
    %20 = vector.load %arg3[%c1, %c0_8, %c0_9] : memref<5x32x24xf32, #tpu.memory_space<vmem>>, vector<1x32x24xf32>
    %21 = vector.shape_cast %20 : vector<1x32x24xf32> to vector<32x24xf32>
    %cst_10 = arith.constant dense<0.000000e+00> : vector<128x24xf32>
    %22 = tpu.matmul %19, %21, %cst_10 {dimension_numbers = #tpu.dot_dimension_numbers<[1], [0], [0], [1], [0, 0, 1, 1], [], []>} : vector<128x32xf32>, vector<32x24xf32>, vector<128x24xf32> -> vector<128x24xf32>
    %23 = arith.addf %17, %22 : vector<128x24xf32>
    %24 = vector.extract_strided_slice %10 {offsets = [0, 2, 0], sizes = [8, 16, 32], strides = [1, 1, 1]} : vector<8x24x32xf32> to vector<8x16x32xf32>
    %25 = vector.shape_cast %24 : vector<8x16x32xf32> to vector<128x32xf32>
    %c2 = arith.constant 2 : index
    %c0_11 = arith.constant 0 : index
    %c0_12 = arith.constant 0 : index
    %26 = vector.load %arg3[%c2, %c0_11, %c0_12] : memref<5x32x24xf32, #tpu.memory_space<vmem>>, vector<1x32x24xf32>
    %27 = vector.shape_cast %26 : vector<1x32x24xf32> to vector<32x24xf32>
    %cst_13 = arith.constant dense<0.000000e+00> : vector<128x24xf32>
    %28 = tpu.matmul %25, %27, %cst_13 {dimension_numbers = #tpu.dot_dimension_numbers<[1], [0], [0], [1], [0, 0, 1, 1], [], []>} : vector<128x32xf32>, vector<32x24xf32>, vector<128x24xf32> -> vector<128x24xf32>
    %29 = arith.addf %23, %28 : vector<128x24xf32>
    %30 = vector.extract_strided_slice %10 {offsets = [0, 3, 0], sizes = [8, 16, 32], strides = [1, 1, 1]} : vector<8x24x32xf32> to vector<8x16x32xf32>
    %31 = vector.shape_cast %30 : vector<8x16x32xf32> to vector<128x32xf32>
    %c3 = arith.constant 3 : index
    %c0_14 = arith.constant 0 : index
    %c0_15 = arith.constant 0 : index
    %32 = vector.load %arg3[%c3, %c0_14, %c0_15] : memref<5x32x24xf32, #tpu.memory_space<vmem>>, vector<1x32x24xf32>
    %33 = vector.shape_cast %32 : vector<1x32x24xf32> to vector<32x24xf32>
    %cst_16 = arith.constant dense<0.000000e+00> : vector<128x24xf32>
    %34 = tpu.matmul %31, %33, %cst_16 {dimension_numbers = #tpu.dot_dimension_numbers<[1], [0], [0], [1], [0, 0, 1, 1], [], []>} : vector<128x32xf32>, vector<32x24xf32>, vector<128x24xf32> -> vector<128x24xf32>
    %35 = arith.addf %29, %34 : vector<128x24xf32>
    %36 = vector.extract_strided_slice %10 {offsets = [0, 4, 0], sizes = [8, 16, 32], strides = [1, 1, 1]} : vector<8x24x32xf32> to vector<8x16x32xf32>
    %37 = vector.shape_cast %36 : vector<8x16x32xf32> to vector<128x32xf32>
    %c4 = arith.constant 4 : index
    %c0_17 = arith.constant 0 : index
    %c0_18 = arith.constant 0 : index
    %38 = vector.load %arg3[%c4, %c0_17, %c0_18] : memref<5x32x24xf32, #tpu.memory_space<vmem>>, vector<1x32x24xf32>
    %39 = vector.shape_cast %38 : vector<1x32x24xf32> to vector<32x24xf32>
    %cst_19 = arith.constant dense<0.000000e+00> : vector<128x24xf32>
    %40 = tpu.matmul %37, %39, %cst_19 {dimension_numbers = #tpu.dot_dimension_numbers<[1], [0], [0], [1], [0, 0, 1, 1], [], []>} : vector<128x32xf32>, vector<32x24xf32>, vector<128x24xf32> -> vector<128x24xf32>
    %41 = arith.addf %35, %40 : vector<128x24xf32>
    %42 = vector.shape_cast %41 : vector<128x24xf32> to vector<8x16x24xf32>
    %c0_20 = arith.constant 0 : index
    %c0_21 = arith.constant 0 : index
    %43 = vector.load %arg4[%c0_20, %c0_21] : memref<1x24xf32, #tpu.memory_space<vmem>>, vector<1x24xf32>
    %44 = vector.shape_cast %43 : vector<1x24xf32> to vector<1x1x24xf32>
    %45 = vector.broadcast %44 : vector<1x1x24xf32> to vector<8x16x24xf32>
    %46 = arith.addf %42, %45 : vector<8x16x24xf32>
    %cst_22 = arith.constant 0.000000e+00 : f32
    %47 = vector.broadcast %cst_22 : f32 to vector<8x16x24xf32>
    %48 = arith.maximumf %46, %47 : vector<8x16x24xf32>
    %c0_23 = arith.constant 0 : index
    %c0_24 = arith.constant 0 : index
    %49 = vector.load %arg5[%c0_23, %c0_24] : memref<16x24xf32, #tpu.memory_space<vmem>>, vector<16x24xf32>
    %50 = vector.shape_cast %49 : vector<16x24xf32> to vector<1x16x24xf32>
    %51 = vector.broadcast %50 : vector<1x16x24xf32> to vector<8x16x24xf32>
    %52 = arith.mulf %48, %51 : vector<8x16x24xf32>
    %cst_25 = arith.constant dense<0xFF800000> : vector<8x24xf32>
    %53 = vector.multi_reduction <maximumf>, %52, %cst_25 [1] : vector<8x16x24xf32> to vector<8x24xf32>
    %c0_26 = arith.constant 0 : index
    %c0_27 = arith.constant 0 : index
    %54 = vector.load %arg6[%c0_26, %c0_27] : memref<1x24xf32, #tpu.memory_space<vmem>>, vector<1x24xf32>
    %55 = vector.broadcast %54 : vector<1x24xf32> to vector<8x24xf32>
    %56 = arith.mulf %53, %55 : vector<8x24xf32>
    %cst_28 = arith.constant dense<0.000000e+00> : vector<8xf32>
    %57 = vector.multi_reduction <add>, %56, %cst_28 [1] : vector<8x24xf32> to vector<8xf32>
    %58 = vector.shape_cast %57 : vector<8xf32> to vector<8x1xf32>
    %c0_29 = arith.constant 0 : index
    %c0_30 = arith.constant 0 : index
    %59 = vector.load %arg7[%c0_29, %c0_30] : memref<1x1xf32, #tpu.memory_space<vmem>>, vector<1x1xf32>
    %60 = vector.broadcast %59 : vector<1x1xf32> to vector<8x1xf32>
    %61 = arith.addf %58, %60 : vector<8x1xf32>
    %62 = arith.negf %61 : vector<8x1xf32>
    %63 = math.exp %62 : vector<8x1xf32>
    %cst_31 = arith.constant 1.000000e+00 : f32
    %64 = vector.broadcast %cst_31 : f32 to vector<8x1xf32>
    %65 = arith.addf %64, %63 : vector<8x1xf32>
    %66 = arith.divf %64, %65 : vector<8x1xf32>
    %c0_32 = arith.constant 0 : index
    %c0_33 = arith.constant 0 : index
    %67 = vector.load %arg8[%c0_32, %c0_33] : memref<8x1xf32, #tpu.memory_space<vmem>>, vector<8x1xf32>
    tpu.vector_store %arg8[%c0_32, %c0_33], %66 {strides = array<i32>} : memref<8x1xf32, #tpu.memory_space<vmem>>, vector<8x1xf32>,
    return
  }
  func.func @transform_0(%arg0: i32) -> (i32, i32) {
    %c0_i32 = arith.constant 0 : i32
    %c0_i32_0 = arith.constant 0 : i32
    return %arg0, %c0_i32 : i32, i32
  }
  func.func @transform_1(%arg0: i32) -> (i32, i32) {
    %c0_i32 = arith.constant 0 : i32
    %c0_i32_0 = arith.constant 0 : i32
    %c0_i32_1 = arith.constant 0 : i32
    return %c0_i32, %c0_i32_0 : i32, i32
  }
  func.func @transform_2(%arg0: i32) -> (i32, i32, i32) {
    %c0_i32 = arith.constant 0 : i32
    %c0_i32_0 = arith.constant 0 : i32
    %c0_i32_1 = arith.constant 0 : i32
    %c0_i32_2 = arith.constant 0 : i32
    return %c0_i32, %c0_i32_0, %c0_i32_1 : i32, i32, i32
  }
  func.func @transform_3(%arg0: i32) -> (i32, i32) {
    %c0_i32 = arith.constant 0 : i32
    %c0_i32_0 = arith.constant 0 : i32
    %c0_i32_1 = arith.constant 0 : i32
    return %c0_i32, %c0_i32_0 : i32, i32
  }
  func.func @transform_4(%arg0: i32) -> (i32, i32) {
    %c0_i32 = arith.constant 0 : i32
    %c0_i32_0 = arith.constant 0 : i32
    %c0_i32_1 = arith.constant 0 : i32
    return %c0_i32, %c0_i32_0 : i32, i32
  }
  func.func @transform_5(%arg0: i32) -> (i32, i32) {
    %c0_i32 = arith.constant 0 : i32
    %c0_i32_0 = arith.constant 0 : i32
    %c0_i32_1 = arith.constant 0 : i32
    return %c0_i32, %c0_i32_0 : i32, i32
  }
  func.func @transform_6(%arg0: i32) -> (i32, i32) {
    %c0_i32 = arith.constant 0 : i32
    %c0_i32_0 = arith.constant 0 : i32
    %c0_i32_1 = arith.constant 0 : i32
    return %c0_i32, %c0_i32_0 : i32, i32
  }
  func.func @transform_7(%arg0: i32) -> (i32, i32) {
    %c0_i32 = arith.constant 0 : i32
    %c0_i32_0 = arith.constant 0 : i32
    return %arg0, %c0_i32 : i32, i32
  }
}

</mosaic_0001>

<bundles_post_ra>
// kernel: tpu_custom_call.1
= control target key start
LH: loop header
LB: loop body
LE: loop exit
PB: predicated region body
PF: predicated region fallthrough
CT: control target
= control target key end

     0   :  { %v29_v0 = vlaneseq  ;;  %vm303_vm0 = vcmask 1042432   ;;  %vm230_vm1 = vcmask 416768   ;;  %v2451_v32 = vmov 0.0   ;;  %s3110_s0 = inlined_call_operand.vmem [shape: s32[8,24], index: 0, kind: input, shape index: {}]   ;;  %s3111_s1 = inlined_call_operand.vmem [shape: f32[51,32], index: 1, kind: input, shape index: {}]   ;;  %s3112_s2 = inlined_call_operand.vmem [shape: f32[5,32,24], index: 2, kind: input, shape index: {}]   ;;  %s3113_s6 = inlined_call_operand.<no memory space> [shape: f32[1,1], index: 6, kind: input, shape index: {}]   ;;  %s3114_s3 = inlined_call_operand.vmem [shape: f32[1,24], index: 3, kind: input, shape index: {}]   ;;  %s3115_s4 = inlined_call_operand.vmem [shape: f32[16,24], index: 4, kind: input, shape index: {}]   ;;  %s3116_s5 = inlined_call_operand.vmem [shape: f32[1,24], index: 5, kind: input, shape index: {}]   ;;  %s3117_s7 = inlined_call_operand.vmem [shape: f32[8,1], index: 7, kind: output, shape index: {}]  }
   0x1   :  { %v223_v1 = vld [vmem:[%s3111_s1] sm:$0xff]  ;;  %v224_v2 = vld [vmem:[%s3111_s1 + $0x8] sm:$0xff]  ;;  %v225_v5 = vld [vmem:[%s3111_s1 + $0x10] sm:$0xff] }
   0x2   :  { %v32_v3 = vshrl.u32 %v29_v0, 7  ;;  %v2326_v4 = vpack.c.bf16 %v224_v2, %v223_v1  ;;  %v226_v6 = vld [vmem:[%s3111_s1 + $0x18] sm:$0xff]  ;;  %v28_v7 = vld [vmem:[%s3110_s0] sm:$0xff]  ;;  %v228_v12 = vld [vmem:[%s3111_s1 + $0x28] sm:$0xff]  ;;  %v2516_v29 = vand.u32 127, %v29_v0 }
   0x3   :  { %v2330_v8 = vpack.c.bf16 %v226_v6, %v225_v5  ;;  %v227_v11 = vld [vmem:[%s3111_s1 + $0x20] sm:$0xff]  ;;  %v229_v16 = vld [vmem:[%s3111_s1 + $0x30] sm:$0x7] }
   0x4   :  { %v33_v9 = vsub.s32 0, %v32_v3  ;;  %v48_v10 = vsub.s32 1, %v32_v3  ;;  %2327 = vmatprep.subr.bf16.mxu0 %v2326_v4  ;;  %v2334_v15 = vpack.c.bf16 %v228_v12, %v227_v11  ;;  %v63_v17 = vsub.s32 2, %v32_v3 }
   0x5   :  { %2329 = vmatpush3.bf16.msra.mxu0 %v2326_v4  ;;  %v78_v19 = vsub.s32 3, %v32_v3  ;;  %v93_v21 = vsub.s32 4, %v32_v3  ;;  %v108_v23 = vsub.s32 5, %v32_v3  ;;  %v123_v25 = vsub.s32 6, %v32_v3 }
   0x6   :  { %v34_v13 = vrot.slane %v28_v7, %v33_v9  ;;  %2331 = vmatprep.subr.bf16.mxu0 %v2330_v8  ;;  %v49_v14 = vrot.slane %v28_v7, %v48_v10  ;;  %v64_v18 = vrot.slane %v28_v7, %v63_v17  ;;  %v138_v27 = vsub.s32 7, %v32_v3 }
   0x7   :  { %v79_v20 = vrot.slane %v28_v7, %v78_v19  ;;  %v94_v22 = vrot.slane %v28_v7, %v93_v21  ;;  %v109_v24 = vrot.slane %v28_v7, %v108_v23  ;;  %v124_v26 = vrot.slane %v28_v7, %v123_v25  ;;  %v1888_v19 = vld [vmem:[%s3112_s2 + $0x38] sm:$0xff]  ;;  %v492_v21 = vld [vmem:[%s3112_s2] sm:$0xff] }
   0x8   :  { %36 = vbcast.lane.b32.xlu0 %v34_v13, 256  ;;  %44 = vbcast.lane.b32.xlu1 %v34_v13, 272  ;;  %v139_v28 = vrot.slane %v28_v7, %v138_v27  ;;  %v495_v25 = vld [vmem:[%s3112_s2 + $0x18] sm:$0xff]  ;;  %v1921_v27 = vld [vmem:[%s3112_s2 + $0x40] sm:$0xff] }
   0x9   :  { %2333 = vmatpush3.bf16.msra.mxu0 %v2330_v8 }
   0xa   :  { %2335 = vmatprep.subr.bf16.mxu0 %v2334_v15 }
   0xc   :  { %40 = vbcast.lane.b32.xlu0 %v34_v13, 264  ;;  %51 = vbcast.lane.b32.xlu1 %v49_v14, 256 }
   0xd   :  { %2337 = vmatpush3.bf16.msra.mxu0 %v2334_v15  ;;  %v1885_v15 = vld [vmem:[%s3112_s2 + $0x20] sm:$0xff] }
   0xe   :  { %2128 = vmatprep.subr.msk.mxu0 %vm303_vm0, %v229_v16 }
  0x10   :  { %55 = vbcast.lane.b32.xlu0 %v49_v14, 264  ;;  %59 = vbcast.lane.b32.xlu1 %v49_v14, 272 }
  0x11   :  { %2129 = vmatpush3.msk.msra.mxu0 %vm303_vm0, %v229_v16  ;;  %v1886_v16 = vld [vmem:[%s3112_s2 + $0x28] sm:$0xff] }
  0x12   :  { %v2338_v17 = vpack.c.bf16 %v1886_v16, %v1885_v15 }
  0x14   :  { %66 = vbcast.lane.b32.xlu0 %v64_v18, 256  ;;  %70 = vbcast.lane.b32.xlu1 %v64_v18, 264 }
  0x15   :  { %2339 = vmatprep.subr.bf16.mxu0 %v2338_v17 }
  0x18   :  { %74 = vbcast.lane.b32.xlu0 %v64_v18, 272  ;;  %81 = vbcast.lane.b32.xlu1 %v79_v20, 256  ;;  %v1887_v18 = vld [vmem:[%s3112_s2 + $0x30] sm:$0xff] }
  0x1c   :  { %85 = vbcast.lane.b32.xlu0 %v79_v20, 264  ;;  %89 = vbcast.lane.b32.xlu1 %v79_v20, 272  ;;  %v2342_v20 = vpack.c.bf16 %v1888_v19, %v1887_v18 }
  0x20   :  { %96 = vbcast.lane.b32.xlu0 %v94_v22, 256  ;;  %100 = vbcast.lane.b32.xlu1 %v94_v22, 264 }
  0x24   :  { %104 = vbcast.lane.b32.xlu0 %v94_v22, 272  ;;  %111 = vbcast.lane.b32.xlu1 %v109_v24, 256  ;;  %v493_v22 = vld [vmem:[%s3112_s2 + $0x8] sm:$0xff] }
  0x25   :  { %v2346_v23 = vpack.c.bf16 %v493_v22, %v492_v21 }
  0x27   :  { %2378 = vmatprep.subr.bf16.mxu1 %v2346_v23 }
  0x28   :  { %115 = vbcast.lane.b32.xlu0 %v109_v24, 264  ;;  %119 = vbcast.lane.b32.xlu1 %v109_v24, 272  ;;  %v494_v24 = vld [vmem:[%s3112_s2 + $0x10] sm:$0xff] }
  0x29   :  { %2380 = vmatpush3.bf16.msra.mxu1 %v2346_v23 }
  0x2c   :  { %126 = vbcast.lane.b32.xlu0 %v124_v26, 256  ;;  %130 = vbcast.lane.b32.xlu1 %v124_v26, 264 }
  0x30   :  { %134 = vbcast.lane.b32.xlu0 %v124_v26, 272  ;;  %141 = vbcast.lane.b32.xlu1 %v139_v28, 256  ;;  %v2614_v26 = vpack.c.bf16 %v495_v25, %v494_v24 }
  0x32   :  { %2379 = vmatprep.subr.bf16.mxu1 %v2614_v26 }
  0x33   :  { %2381 = vmatpush3.bf16.msra.mxu1 %v2614_v26 }
  0x34   :  { %145 = vbcast.lane.b32.xlu0 %v139_v28, 264  ;;  %149 = vbcast.lane.b32.xlu1 %v139_v28, 272  ;;  %v1922_v28 = vld [vmem:[%s3112_s2 + $0x48] sm:$0xff] }
  0x7a   :  { %v37_v30 = vpop.permute.xlu0 %36  ;;  %v45_v31 = vpop.permute.xlu1 %44 }
  0x7b   :  { %vm151_vm2 = vcmp.eq.s32.totalorder %v2516_v29, %v37_v30  ;;  %vm153_vm3 = vcmp.eq.s32.totalorder %v2516_v29, %v45_v31 }
  0x7c   :  { %v1836_v33 = vsel %vm151_vm2, 1.0, %v2451_v32  ;;  %v1838_v36 = vsel %vm153_vm3, 1.0, %v2451_v32 }
  0x7d   :  { %2130 = vmatprep.mubr.msk.f32.mxu0 %vm230_vm1, %v1836_v33 }
  0x7e   :  { %v41_v34 = vpop.permute.xlu0 %40  ;;  %v52_v35 = vpop.permute.xlu1 %51 }
  0x7f   :  { %vm152_vm4 = vcmp.eq.s32.totalorder %v2516_v29, %v41_v34  ;;  %vm154_vm5 = vcmp.eq.s32.totalorder %v2516_v29, %v52_v35 }
  0x80   :  { %v1837_v37 = vsel %vm152_vm4, 1.0, %v2451_v32  ;;  %v1839_v38 = vsel %vm154_vm5, 1.0, %v2451_v32 }
  0x81   :  { %2131 = vmatmul.mubr.msk.f32.vlgmr.msra.gmra.mrb[0].mxu0 %vm230_vm1, %v1837_v37 }
  0x82   :  { %2133 = vmatprep.mubr.msk.f32.mxu0 %vm230_vm1, %v1838_v36  ;;  %v56_v39 = vpop.permute.xlu0 %55  ;;  %v60_v40 = vpop.permute.xlu1 %59  ;;  %2341 = vmatpush3.bf16.msra.mxu0 %v2338_v17 }
  0x83   :  { %vm155_vm6 = vcmp.eq.s32.totalorder %v2516_v29, %v56_v39  ;;  %vm156_vm7 = vcmp.eq.s32.totalorder %v2516_v29, %v60_v40  ;;  %2343 = vmatprep.subr.bf16.mxu0 %v2342_v20 }
  0x84   :  { %v1840_v41 = vsel %vm155_vm6, 1.0, %v2451_v32  ;;  %v1841_v42 = vsel %vm156_vm7, 1.0, %v2451_v32 }
  0x85   :  { %2134 = vmatmul.mubr.msk.f32.gmra.mrb[2].mxu0 %vm230_vm1, %v1839_v38 }
  0x86   :  { %2136 = vmatprep.mubr.msk.f32.mxu0 %vm230_vm1, %v1840_v41  ;;  %v67_v43 = vpop.permute.xlu0 %66  ;;  %v71_v44 = vpop.permute.xlu1 %70  ;;  %2345 = vmatpush3.bf16.msra.mxu0 %v2342_v20 }
  0x87   :  { %vm157_vm8 = vcmp.eq.s32.totalorder %v2516_v29, %v67_v43  ;;  %vm158_vm9 = vcmp.eq.s32.totalorder %v2516_v29, %v71_v44  ;;  %2347 = vmatprep.subr.bf16.mxu0 %v2346_v23 }
  0x88   :  { %v1842_v45 = vsel %vm157_vm8, 1.0, %v2451_v32  ;;  %v1843_v46 = vsel %vm158_vm9, 1.0, %v2451_v32 }
  0x89   :  { %2137 = vmatmul.mubr.msk.f32.gmra.mrb[4].mxu0 %vm230_vm1, %v1841_v42 }
  0x8a   :  { %2139 = vmatprep.mubr.msk.f32.mxu0 %vm230_vm1, %v1842_v45  ;;  %v75_v47 = vpop.permute.xlu0 %74  ;;  %v82_v48 = vpop.permute.xlu1 %81 }
  0x8b   :  { %vm159_vm10 = vcmp.eq.s32.totalorder %v2516_v29, %v75_v47  ;;  %vm160_vm11 = vcmp.eq.s32.totalorder %v2516_v29, %v82_v48 }
  0x8c   :  { %v1844_v49 = vsel %vm159_vm10, 1.0, %v2451_v32  ;;  %v1845_v50 = vsel %vm160_vm11, 1.0, %v2451_v32  ;;  %vm566_vm11 = vcmask 261120  }
  0x8d   :  { %2140 = vmatmul.mubr.msk.f32.gmra.mrb[6].mxu0 %vm230_vm1, %v1843_v46 }
  0x8e   :  { %2142 = vmatprep.mubr.msk.f32.mxu0 %vm230_vm1, %v1844_v49  ;;  %v86_v51 = vpop.permute.xlu0 %85  ;;  %v90_v52 = vpop.permute.xlu1 %89 }
  0x8f   :  { %vm161_vm12 = vcmp.eq.s32.totalorder %v2516_v29, %v86_v51  ;;  %vm162_vm13 = vcmp.eq.s32.totalorder %v2516_v29, %v90_v52 }
  0x90   :  { %v1846_v53 = vsel %vm161_vm12, 1.0, %v2451_v32  ;;  %v1847_v54 = vsel %vm162_vm13, 1.0, %v2451_v32  ;;  %vm921_vm12 = vcmask 1045504   ;;  %vm1160_vm13 = vcmask 1044480  }
  0x91   :  { %2143 = vmatmul.mubr.msk.f32.gmra.mrb[8].mxu0 %vm230_vm1, %v1845_v50 }
  0x92   :  { %2145 = vmatprep.mubr.msk.f32.mxu0 %vm230_vm1, %v1846_v53  ;;  %v97_v55 = vpop.permute.xlu0 %96  ;;  %v101_v56 = vpop.permute.xlu1 %100 }
  0x93   :  { %vm163_vm14 = vcmp.eq.s32.totalorder %v2516_v29, %v97_v55  ;;  %vm164_vm15 = vcmp.eq.s32.totalorder %v2516_v29, %v101_v56 }
  0x94   :  { %v1848_v57 = vsel %vm163_vm14, 1.0, %v2451_v32  ;;  %v1849_v58 = vsel %vm164_vm15, 1.0, %v2451_v32  ;;  %vm1399_vm14 = vcmask 1043456   ;;  %vm1695_vm15 = vcmask 195584  }
  0x95   :  { %2146 = vmatmul.mubr.msk.f32.gmra.mrb[10].mxu0 %vm230_vm1, %v1847_v54 }
  0x96   :  { %2148 = vmatprep.mubr.msk.f32.mxu0 %vm230_vm1, %v1848_v57  ;;  %v105_v59 = vpop.permute.xlu0 %104  ;;  %v112_v60 = vpop.permute.xlu1 %111 }
  0x97   :  { %vm165_vm0 = vcmp.eq.s32.totalorder %v2516_v29, %v105_v59  ;;  %vm166_vm2 = vcmp.eq.s32.totalorder %v2516_v29, %v112_v60 }
  0x98   :  { %v1850_v61 = vsel %vm165_vm0, 1.0, %v2451_v32  ;;  %v1851_v62 = vsel %vm166_vm2, 1.0, %v2451_v32  ;;  %vm1792_vm0 = vcmask 1041409   ;;  %vm1795_vm2 = vcmask 1042434  }
  0x99   :  { %2149 = vmatmul.mubr.msk.f32.gmra.mrb[12].mxu0 %vm230_vm1, %v1849_v58 }
  0x9a   :  { %2151 = vmatprep.mubr.msk.f32.mxu0 %vm230_vm1, %v1850_v61  ;;  %v116_v63 = vpop.permute.xlu0 %115  ;;  %v120_v0 = vpop.permute.xlu1 %119 }
  0x9b   :  { %vm167_vm3 = vcmp.eq.s32.totalorder %v2516_v29, %v116_v63  ;;  %vm168_vm4 = vcmp.eq.s32.totalorder %v2516_v29, %v120_v0 }
  0x9c   :  { %v1852_v1 = vsel %vm167_vm3, 1.0, %v2451_v32  ;;  %v1853_v2 = vsel %vm168_vm4, 1.0, %v2451_v32  ;;  %vm1798_vm3 = vcmask 1043459   ;;  %vm1801_vm4 = vcmask 1044484  }
  0x9d   :  { %2152 = vmatmul.mubr.msk.f32.gmra.mrb[14].mxu0 %vm230_vm1, %v1851_v62 }
  0x9e   :  { %2154 = vmatprep.mubr.msk.f32.mxu0 %vm230_vm1, %v1852_v1  ;;  %v127_v3 = vpop.permute.xlu0 %126  ;;  %v131_v4 = vpop.permute.xlu1 %130 }
  0x9f   :  { %vm169_vm5 = vcmp.eq.s32.totalorder %v2516_v29, %v127_v3  ;;  %vm170_vm6 = vcmp.eq.s32.totalorder %v2516_v29, %v131_v4 }
  0xa0   :  { %v1854_v5 = vsel %vm169_vm5, 1.0, %v2451_v32  ;;  %v1855_v6 = vsel %vm170_vm6, 1.0, %v2451_v32  ;;  %vm1804_vm5 = vcmask 1045509   ;;  %vm1807_vm6 = vcmask 1046534  }
  0xa1   :  { %2155 = vmatmul.mubr.msk.f32.gmra.mrb[16].mxu0 %vm230_vm1, %v1853_v2 }
  0xa2   :  { %2157 = vmatprep.mubr.msk.f32.mxu0 %vm230_vm1, %v1854_v5  ;;  %v135_v7 = vpop.permute.xlu0 %134  ;;  %v142_v8 = vpop.permute.xlu1 %141 }
  0xa3   :  { %vm171_vm7 = vcmp.eq.s32.totalorder %v2516_v29, %v135_v7  ;;  %vm172_vm8 = vcmp.eq.s32.totalorder %v2516_v29, %v142_v8 }
  0xa4   :  { %v1856_v9 = vsel %vm171_vm7, 1.0, %v2451_v32  ;;  %v1857_v10 = vsel %vm172_vm8, 1.0, %v2451_v32  ;;  %vm1810_vm7 = vcmask 1047559   ;;  %vm1830_vm8 = vcmask 7168  }
  0xa5   :  { %2158 = vmatmul.mubr.msk.f32.gmra.mrb[18].mxu0 %vm230_vm1, %v1855_v6 }
  0xa6   :  { %2160 = vmatprep.mubr.msk.f32.mxu0 %vm230_vm1, %v1856_v9  ;;  %v146_v11 = vpop.permute.xlu0 %145  ;;  %v150_v12 = vpop.permute.xlu1 %149 }
  0xa7   :  { %vm173_vm9 = vcmp.eq.s32.totalorder %v2516_v29, %v146_v11  ;;  %vm174_vm10 = vcmp.eq.s32.totalorder %v2516_v29, %v150_v12  ;;  %v2624_v29 = vpack.c.bf16 %v1922_v28, %v1921_v27 }
  0xa8   :  { %v1858_v13 = vsel %vm173_vm9, 1.0, %v2451_v32  ;;  %v1859_v14 = vsel %vm174_vm10, 1.0, %v2451_v32 }
  0xa9   :  { %2161 = vmatmul.mubr.msk.f32.gmra.mrb[20].mxu0 %vm230_vm1, %v1857_v10  ;;  %2355 = vmatprep.subr.bf16.mxu1 %v2624_v29 }
  0xaa   :  { %2163 = vmatprep.mubr.msk.f32.mxu0 %vm230_vm1, %v1858_v13 }
  0xad   :  { %2164 = vmatmul.mubr.msk.f32.gmra.mrb[22].mxu0 %vm230_vm1, %v1859_v14  ;;  %vm520_vm1 = vcmask 1046528  }
 0x154   :  { %v2627_v30 = vpop.f32.mrb[0].mxu0 }
 0x155   :  { %v2629_v31 = vpop.f32.mrb[1].mxu0  ;;  %v522_v32 = vrot.slane %v2627_v30, 1  ;;  %v923_v33 = vrot.slane %v2627_v30, 2  ;;  %v1162_v34 = vrot.slane %v2627_v30, 3  ;;  %v1401_v35 = vrot.slane %v2627_v30, 4 }
 0x156   :  { %v521_v36 = vrot.slane %v2629_v31, 1  ;;  %v922_v37 = vrot.slane %v2629_v31, 2  ;;  %v1161_v38 = vrot.slane %v2629_v31, 3  ;;  %v1400_v39 = vrot.slane %v2629_v31, 4 }
 0x158   :  { %v2639_v40 = vpop.f32.mrb[2].mxu0  ;;  %v523_v41 = vsel %vm520_vm1, %v521_v36, %v522_v32  ;;  %v2643_v42 = vsel %vm921_vm12, %v922_v37, %v923_v33  ;;  %v2646_v43 = vsel %vm1160_vm13, %v1161_v38, %v1162_v34  ;;  %v2649_v44 = vsel %vm1399_vm14, %v1400_v39, %v1401_v35 }
 0x159   :  { %v383_v45 = vpop.f32.mrb[3].mxu0  ;;  %2174 = vmatprep.mubr.msk.f32.mxu0 %vm566_vm11, %v523_v41  ;;  %v526_v59 = vrot.slane %v2639_v40, 1  ;;  %v927_v61 = vrot.slane %v2639_v40, 2  ;;  %v1166_v1 = vrot.slane %v2639_v40, 3  ;;  %v1405_v2 = vrot.slane %v2639_v40, 4 }
 0x15a   :  { %v524_v46 = vrot.slane %v383_v45, 1  ;;  %v925_v47 = vrot.slane %v383_v45, 2  ;;  %v1164_v48 = vrot.slane %v383_v45, 3  ;;  %v1403_v49 = vrot.slane %v383_v45, 4 }
 0x15c   :  { %v2138_v50 = vpop.f32.mrb[4].mxu0  ;;  %v525_v51 = vsel %vm520_vm1, %v522_v32, %v524_v46  ;;  %v2654_v52 = vsel %vm921_vm12, %v923_v33, %v925_v47  ;;  %v2657_v53 = vsel %vm1160_vm13, %v1162_v34, %v1164_v48  ;;  %v2660_v54 = vsel %vm1399_vm14, %v1401_v35, %v1403_v49 }
 0x15d   :  { %v529_v55 = vrot.slane %v2138_v50, 1  ;;  %v930_v56 = vrot.slane %v2138_v50, 2  ;;  %v1169_v57 = vrot.slane %v2138_v50, 3  ;;  %v2662_v58 = vpop.f32.mrb[5].mxu0  ;;  %2175 = vmatmul.mubr.msk.f32.vlgmr.msra.gmra.mrb[24].mxu0 %vm566_vm11, %v525_v51  ;;  %v1408_v0 = vrot.slane %v2138_v50, 4 }
 0x15e   :  { %v527_v60 = vrot.slane %v2662_v58, 1  ;;  %2349 = vmatpush3.bf16.msra.mxu0 %v2346_v23  ;;  %v928_v62 = vrot.slane %v2662_v58, 2  ;;  %v1167_v63 = vrot.slane %v2662_v58, 3  ;;  %v1406_v3 = vrot.slane %v2662_v58, 4 }
 0x15f   :  { %2351 = vmatprep.subr.bf16.mxu0 %v2614_v26 }
 0x160   :  { %v2674_v4 = vpop.f32.mrb[6].mxu0  ;;  %v528_v5 = vsel %vm520_vm1, %v526_v59, %v527_v60  ;;  %v530_v6 = vsel %vm520_vm1, %v527_v60, %v529_v55  ;;  %v2679_v7 = vsel %vm921_vm12, %v927_v61, %v928_v62  ;;  %v2682_v8 = vsel %vm921_vm12, %v928_v62, %v930_v56 }
 0x161   :  { %v2684_v9 = vpop.f32.mrb[7].mxu0  ;;  %2177 = vmatprep.mubr.msk.f32.mxu0 %vm566_vm11, %v528_v5  ;;  %v532_v10 = vrot.slane %v2674_v4, 1  ;;  %v933_v11 = vrot.slane %v2674_v4, 2  ;;  %v2690_v12 = vsel %vm1160_vm13, %v1166_v1, %v1167_v63  ;;  %v2693_v13 = vsel %vm1160_vm13, %v1167_v63, %v1169_v57 }
 0x162   :  { %2178 = vmatmul.mubr.msk.f32.gmra.mrb[26].mxu0 %vm566_vm11, %v530_v6  ;;  %v531_v14 = vrot.slane %v2684_v9, 1  ;;  %v932_v15 = vrot.slane %v2684_v9, 2  ;;  %v1171_v16 = vrot.slane %v2684_v9, 3  ;;  %v1172_v17 = vrot.slane %v2674_v4, 3 }
 0x163   :  { %2353 = vmatpush3.bf16.msra.mxu0 %v2614_v26  ;;  %v2702_v18 = vsel %vm1399_vm14, %v1405_v2, %v1406_v3  ;;  %v2705_v19 = vsel %vm1399_vm14, %v1406_v3, %v1408_v0  ;;  %v1410_v20 = vrot.slane %v2684_v9, 4  ;;  %v1411_v21 = vrot.slane %v2674_v4, 4 }
 0x164   :  { %3118 = vst [vmem:[#allocation3_spill] sm:$0xff] %v2702_v18  ;;  %3119 = vst [vmem:[#allocation4_spill] sm:$0xff] %v2705_v19  ;;  %v2709_v22 = vpop.f32.mrb[8].mxu0  ;;  %v533_v23 = vsel %vm520_vm1, %v531_v14, %v532_v10  ;;  %v2713_v24 = vsel %vm921_vm12, %v932_v15, %v933_v11  ;;  %v2716_v25 = vsel %vm1160_vm13, %v1171_v16, %v1172_v17 }
 0x165   :  { %v413_v26 = vpop.f32.mrb[9].mxu0  ;;  %2180 = vmatprep.mubr.msk.f32.mxu0 %vm566_vm11, %v533_v23  ;;  %v2720_v27 = vsel %vm1399_vm14, %v1410_v20, %v1411_v21  ;;  %v536_v48 = vrot.slane %v2709_v22, 1  ;;  %v937_v50 = vrot.slane %v2709_v22, 2  ;;  %v1176_v57 = vrot.slane %v2709_v22, 3 }
 0x166   :  { %3120 = vst [vmem:[#allocation5_spill] sm:$0xff] %v2720_v27  ;;  %v534_v28 = vrot.slane %v413_v26, 1  ;;  %v935_v32 = vrot.slane %v413_v26, 2  ;;  %v1174_v33 = vrot.slane %v413_v26, 3  ;;  %v1413_v34 = vrot.slane %v413_v26, 4 }
 0x167   :  { %v1415_v59 = vrot.slane %v2709_v22, 4 }
 0x168   :  { %v2147_v35 = vpop.f32.mrb[10].mxu0  ;;  %v535_v36 = vsel %vm520_vm1, %v532_v10, %v534_v28  ;;  %v2724_v37 = vsel %vm921_vm12, %v933_v11, %v935_v32  ;;  %v2727_v38 = vsel %vm1160_vm13, %v1172_v17, %v1174_v33  ;;  %v2730_v39 = vsel %vm1399_vm14, %v1411_v21, %v1413_v34  ;;  %v1923_v17 = vld [vmem:[%s3112_s2 + $0x50] sm:$0xff]  ;;  %v1924_v33 = vld [vmem:[%s3112_s2 + $0x58] sm:$0xff]  ;;  %v1941_v34 = vld [vmem:[%s3112_s2 + $0x60] sm:$0xff] }
 0x169   :  { %3121 = vst [vmem:[#allocation6_spill] sm:$0xff] %v2730_v39  ;;  %v539_v41 = vrot.slane %v2147_v35, 1  ;;  %v940_v45 = vrot.slane %v2147_v35, 2  ;;  %v1179_v46 = vrot.slane %v2147_v35, 3  ;;  %v2732_v47 = vpop.f32.mrb[11].mxu0  ;;  %2181 = vmatmul.mubr.msk.f32.gmra.mrb[28].mxu0 %vm566_vm11, %v535_v36  ;;  %v1418_v56 = vrot.slane %v2147_v35, 4 }
 0x16a   :  { %v537_v49 = vrot.slane %v2732_v47, 1  ;;  %v938_v51 = vrot.slane %v2732_v47, 2  ;;  %v1177_v55 = vrot.slane %v2732_v47, 3  ;;  %v1416_v60 = vrot.slane %v2732_v47, 4  ;;  %v1942_v35 = vld [vmem:[%s3112_s2 + $0x68] sm:$0xff] }
 0x16c   :  { %v2743_v61 = vpop.f32.mrb[12].mxu0  ;;  %v538_v62 = vsel %vm520_vm1, %v536_v48, %v537_v49  ;;  %v540_v63 = vsel %vm520_vm1, %v537_v49, %v539_v41  ;;  %v2748_v0 = vsel %vm921_vm12, %v937_v50, %v938_v51  ;;  %v2751_v1 = vsel %vm921_vm12, %v938_v51, %v940_v45 }
 0x16d   :  { %v2753_v2 = vpop.f32.mrb[13].mxu0  ;;  %2183 = vmatprep.mubr.msk.f32.mxu0 %vm566_vm11, %v538_v62  ;;  %v542_v3 = vrot.slane %v2743_v61, 1  ;;  %v943_v5 = vrot.slane %v2743_v61, 2  ;;  %v2759_v6 = vsel %vm1160_vm13, %v1176_v57, %v1177_v55  ;;  %v2762_v10 = vsel %vm1160_vm13, %v1177_v55, %v1179_v46 }
 0x16e   :  { %2184 = vmatmul.mubr.msk.f32.gmra.mrb[30].mxu0 %vm566_vm11, %v540_v63  ;;  %v541_v11 = vrot.slane %v2753_v2, 1  ;;  %v942_v14 = vrot.slane %v2753_v2, 2  ;;  %v1181_v15 = vrot.slane %v2753_v2, 3  ;;  %v1182_v16 = vrot.slane %v2743_v61, 3 }
 0x16f   :  { %v2773_v20 = vsel %vm1399_vm14, %v1415_v59, %v1416_v60  ;;  %v2776_v21 = vsel %vm1399_vm14, %v1416_v60, %v1418_v56  ;;  %v1420_v23 = vrot.slane %v2753_v2, 4  ;;  %v1421_v26 = vrot.slane %v2743_v61, 4 }
 0x170   :  { %3122 = vst [vmem:[#allocation7_spill] sm:$0xff] %v2773_v20  ;;  %3123 = vst [vmem:[#allocation8_spill] sm:$0xff] %v2776_v21  ;;  %v2153_v28 = vpop.f32.mrb[14].mxu0  ;;  %v543_v32 = vsel %vm520_vm1, %v541_v11, %v542_v3  ;;  %v2791_v36 = vsel %vm921_vm12, %v942_v14, %v943_v5  ;;  %v2794_v41 = vsel %vm1160_vm13, %v1181_v15, %v1182_v16 }
 0x171   :  { %v443_v45 = vpop.f32.mrb[15].mxu0  ;;  %2186 = vmatprep.mubr.msk.f32.mxu0 %vm566_vm11, %v543_v32  ;;  %2221 = vmatprep.mubr.msk.f32.mxu1 %vm566_vm11, %v2153_v28  ;;  %v2799_v46 = vsel %vm1399_vm14, %v1420_v23, %v1421_v26  ;;  %v2358_v55 = vpack.c.bf16 %v1924_v33, %v1923_v17  ;;  %v2801_v56 = vpack.c.bf16 %v1942_v35, %v1941_v34  ;;  %v546_v17 = vrot.slane %v2153_v28, 1 }
 0x172   :  { %3124 = vst [vmem:[#allocation9_spill] sm:$0xff] %v2799_v46  ;;  %v544_v48 = vrot.slane %v443_v45, 1  ;;  %v945_v49 = vrot.slane %v443_v45, 2  ;;  %v1184_v50 = vrot.slane %v443_v45, 3  ;;  %v1423_v51 = vrot.slane %v443_v45, 4 }
 0x173   :  { %v1425_v35 = vrot.slane %v2153_v28, 4 }
 0x174   :  { %v2156_v57 = vpop.f32.mrb[16].mxu0  ;;  %v545_v59 = vsel %vm520_vm1, %v542_v3, %v544_v48  ;;  %v2805_v60 = vsel %vm921_vm12, %v943_v5, %v945_v49  ;;  %v2808_v62 = vsel %vm1160_vm13, %v1182_v16, %v1184_v50  ;;  %v2811_v63 = vsel %vm1399_vm14, %v1421_v26, %v1423_v51 }
 0x175   :  { %3125 = vst [vmem:[#allocation10_spill] sm:$0xff] %v2811_v63  ;;  %v549_v11 = vrot.slane %v2156_v57, 1  ;;  %v950_v14 = vrot.slane %v2156_v57, 2  ;;  %v1189_v15 = vrot.slane %v2156_v57, 3  ;;  %v453_v23 = vpop.f32.mrb[17].mxu0  ;;  %2187 = vmatmul.mubr.msk.f32.gmra.mrb[32].mxu0 %vm566_vm11, %v545_v59  ;;  %v947_v3 = vrot.slane %v2153_v28, 2 }
 0x176   :  { %2222 = vmatmul.mubr.msk.f32.vlgmr.msra.gmra.mrb[0].mxu1 %vm566_vm11, %v453_v23  ;;  %v547_v32 = vrot.slane %v453_v23, 1  ;;  %v948_v33 = vrot.slane %v453_v23, 2  ;;  %v1187_v5 = vrot.slane %v453_v23, 3  ;;  %v1428_v34 = vrot.slane %v2156_v57, 4 }
 0x177   :  { %2357 = vmatpush3.bf16.msra.mxu1 %v2624_v29  ;;  %v1186_v16 = vrot.slane %v2153_v28, 3  ;;  %v1426_v26 = vrot.slane %v453_v23, 4 }
 0x178   :  { %v2159_v45 = vpop.f32.mrb[18].mxu0  ;;  %v548_v48 = vsel %vm520_vm1, %v546_v17, %v547_v32  ;;  %v550_v49 = vsel %vm520_vm1, %v547_v32, %v549_v11  ;;  %2359 = vmatprep.subr.bf16.mxu1 %v2358_v55  ;;  %v2819_v50 = vsel %vm921_vm12, %v947_v3, %v948_v33  ;;  %v2822_v51 = vsel %vm921_vm12, %v948_v33, %v950_v14 }
 0x179   :  { %v463_v59 = vpop.f32.mrb[19].mxu0  ;;  %2189 = vmatprep.mubr.msk.f32.mxu0 %vm566_vm11, %v548_v48  ;;  %v552_v57 = vrot.slane %v2159_v45, 1  ;;  %v953_v29 = vrot.slane %v2159_v45, 2  ;;  %v2826_v28 = vsel %vm1160_vm13, %v1186_v16, %v1187_v5  ;;  %v2829_v23 = vsel %vm1160_vm13, %v1187_v5, %v1189_v15 }
 0x17a   :  { %2190 = vmatmul.mubr.msk.f32.gmra.mrb[34].mxu0 %vm566_vm11, %v550_v49  ;;  %2224 = vmatprep.mubr.msk.f32.mxu1 %vm566_vm11, %v463_v59  ;;  %v551_v11 = vrot.slane %v463_v59, 1  ;;  %v952_v17 = vrot.slane %v463_v59, 2  ;;  %v1191_v32 = vrot.slane %v463_v59, 3  ;;  %v1192_v14 = vrot.slane %v2159_v45, 3 }
 0x17b   :  { %2225 = vmatmul.mubr.msk.f32.gmra.mrb[2].mxu1 %vm566_vm11, %v2159_v45  ;;  %v2835_v3 = vsel %vm1399_vm14, %v1425_v35, %v1426_v26  ;;  %v2838_v33 = vsel %vm1399_vm14, %v1426_v26, %v1428_v34  ;;  %v1430_v16 = vrot.slane %v463_v59, 4  ;;  %v1431_v48 = vrot.slane %v2159_v45, 4 }
 0x17c   :  { %3126 = vst [vmem:[#allocation11_spill] sm:$0xff] %v2835_v3  ;;  %3127 = vst [vmem:[#allocation12_spill] sm:$0xff] %v2838_v33  ;;  %v2162_v15 = vpop.f32.mrb[20].mxu0  ;;  %v553_v5 = vsel %vm520_vm1, %v551_v11, %v552_v57  ;;  %2361 = vmatpush3.bf16.msra.mxu1 %v2358_v55  ;;  %v2842_v49 = vsel %vm921_vm12, %v952_v17, %v953_v29  ;;  %v2845_v63 = vsel %vm1160_vm13, %v1191_v32, %v1192_v14 }
 0x17d   :  { %v473_v46 = vpop.f32.mrb[21].mxu0  ;;  %2192 = vmatprep.mubr.msk.f32.mxu0 %vm566_vm11, %v553_v5  ;;  %2227 = vmatprep.mubr.msk.f32.mxu1 %vm566_vm11, %v2162_v15  ;;  %v2850_v34 = vsel %vm1399_vm14, %v1430_v16, %v1431_v48  ;;  %v556_v55 = vrot.slane %v2162_v15, 1  ;;  %v957_v11 = vrot.slane %v2162_v15, 2  ;;  %v1943_v5 = vld [vmem:[%s3112_s2 + $0x70] sm:$0xff]  ;;  %v1944_v16 = vld [vmem:[%s3112_s2 + $0x78] sm:$0xff] }
 0x17e   :  { %3128 = vst [vmem:[#allocation13_spill] sm:$0xff] %v2850_v34  ;;  %v554_v35 = vrot.slane %v473_v46, 1  ;;  %v955_v26 = vrot.slane %v473_v46, 2  ;;  %v1194_v45 = vrot.slane %v473_v46, 3  ;;  %v1433_v59 = vrot.slane %v473_v46, 4  ;;  %2363 = vmatprep.subr.bf16.mxu1 %v2801_v56 }
 0x180   :  { %v2165_v17 = vpop.f32.mrb[22].mxu0  ;;  %v555_v32 = vsel %vm520_vm1, %v552_v57, %v554_v35  ;;  %v956_v34 = vsel %vm921_vm12, %v953_v29, %v955_v26  ;;  %v2862_v33 = vsel %vm1160_vm13, %v1192_v14, %v1194_v45  ;;  %v2865_v46 = vsel %vm1399_vm14, %v1431_v48, %v1433_v59 }
 0x181   :  { %3129 = vst [vmem:[#allocation14_spill] sm:$0xff] %v2865_v46  ;;  %v559_v3 = vrot.slane %v2165_v17, 1  ;;  %v960_v21 = vrot.slane %v2165_v17, 2  ;;  %v1199_v20 = vrot.slane %v2165_v17, 3  ;;  %v1438_v57 = vrot.slane %v2165_v17, 4  ;;  %v483_v35 = vpop.f32.mrb[23].mxu0  ;;  %2193 = vmatmul.mubr.msk.f32.gmra.mrb[36].mxu0 %vm566_vm11, %v555_v32 }
 0x182   :  { %2228 = vmatmul.mubr.msk.f32.gmra.mrb[4].mxu1 %vm566_vm11, %v483_v35  ;;  %v557_v39 = vrot.slane %v483_v35, 1  ;;  %v958_v27 = vrot.slane %v483_v35, 2  ;;  %v1197_v19 = vrot.slane %v483_v35, 3  ;;  %v1436_v18 = vrot.slane %v483_v35, 4 }
 0x183   :  { %2238 = vmatprep.mubr.msk.f32.mxu1 %vm566_vm11, %v2643_v42  ;;  %v2366_v29 = vpack.c.bf16 %v1944_v16, %v1943_v5  ;;  %v1196_v14 = vrot.slane %v2162_v15, 3  ;;  %v1435_v48 = vrot.slane %v2162_v15, 4  ;;  %v3037_v15 = vld [vmem:[%s3115_s4] sm:$0xff] }
 0x184   :  { %v558_v26 = vsel %vm520_vm1, %v556_v55, %v557_v39  ;;  %v560_v45 = vsel %vm520_vm1, %v557_v39, %v559_v3  ;;  %v959_v59 = vsel %vm921_vm12, %v957_v11, %v958_v27  ;;  %v961_v17 = vsel %vm921_vm12, %v958_v27, %v960_v21  ;;  %v1961_v27 = vld [vmem:[%s3112_s2 + $0x80] sm:$0xff]  ;;  %v1962_v39 = vld [vmem:[%s3112_s2 + $0x88] sm:$0xff] }
 0x185   :  { %2195 = vmatprep.mubr.msk.f32.mxu0 %vm566_vm11, %v558_v26  ;;  %v1198_v32 = vsel %vm1160_vm13, %v1196_v14, %v1197_v19  ;;  %v1200_v35 = vsel %vm1160_vm13, %v1197_v19, %v1199_v20  ;;  %v2879_v46 = vsel %vm1399_vm14, %v1435_v48, %v1436_v18  ;;  %v2882_v42 = vsel %vm1399_vm14, %v1436_v18, %v1438_v57 }
 0x186   :  { %2196 = vmatmul.mubr.msk.f32.gmra.mrb[38].mxu0 %vm566_vm11, %v560_v45  ;;  %2239 = vmatmul.mubr.msk.f32.vlgmr.msra.gmra.mrb[6].mxu1 %vm566_vm11, %v2654_v52  ;;  %v2370_v18 = vpack.c.bf16 %v1962_v39, %v1961_v27  ;;  %v3131_v52 = vld [vmem:[#allocation4_spill] sm:$0xff] }
 0x187   :  { %2365 = vmatpush3.bf16.msra.mxu1 %v2801_v56  ;;  %2206 = vmatprep.mubr.msk.f32.mxu0 %vm566_vm11, %v2629_v31  ;;  %v1964_v31 = vld [vmem:[%s3112_s2 + $0x98] sm:$0xff] }
 0x188   :  { %2241 = vmatprep.mubr.msk.f32.mxu1 %vm566_vm11, %v2679_v7  ;;  %2367 = vmatprep.subr.bf16.mxu1 %v2366_v29  ;;  %v3135_v7 = vld [vmem:[#allocation8_spill] sm:$0xff] }
 0x18a   :  { %2207 = vmatmul.mubr.msk.f32.vlgmr.msra.gmra.mrb[24].mxu0 %vm566_vm11, %v2627_v30  ;;  %2242 = vmatmul.mubr.msk.f32.gmra.mrb[8].mxu1 %vm566_vm11, %v2682_v8  ;;  %v1963_v30 = vld [vmem:[%s3112_s2 + $0x90] sm:$0xff]  ;;  %v3138_v8 = vld [vmem:[#allocation11_spill] sm:$0xff] }
 0x18b   :  { %2209 = vmatprep.mubr.msk.f32.mxu0 %vm566_vm11, %v2639_v40  ;;  %2244 = vmatprep.mubr.msk.f32.mxu1 %vm566_vm11, %v2713_v24  ;;  %v2374_v40 = vpack.c.bf16 %v1964_v31, %v1963_v30 }
 0x18c   :  { %2369 = vmatpush3.bf16.msra.mxu1 %v2366_v29 }
 0x18d   :  { %2371 = vmatprep.subr.bf16.mxu1 %v2370_v18 }
 0x18e   :  { %2210 = vmatmul.mubr.msk.f32.gmra.mrb[26].mxu0 %vm566_vm11, %v2662_v58  ;;  %2245 = vmatmul.mubr.msk.f32.gmra.mrb[10].mxu1 %vm566_vm11, %v2724_v37  ;;  %v3133_v58 = vld [vmem:[#allocation6_spill] sm:$0xff] }
 0x18f   :  { %2212 = vmatprep.mubr.msk.f32.mxu0 %vm566_vm11, %v2684_v9  ;;  %2247 = vmatprep.mubr.msk.f32.mxu1 %vm566_vm11, %v2748_v0  ;;  %v3139_v9 = vld [vmem:[#allocation12_spill] sm:$0xff] }
 0x192   :  { %2213 = vmatmul.mubr.msk.f32.gmra.mrb[28].mxu0 %vm566_vm11, %v2674_v4  ;;  %2248 = vmatmul.mubr.msk.f32.gmra.mrb[12].mxu1 %vm566_vm11, %v2751_v1  ;;  %v3134_v4 = vld [vmem:[#allocation7_spill] sm:$0xff] }
 0x193   :  { %2215 = vmatprep.mubr.msk.f32.mxu0 %vm566_vm11, %v2709_v22  ;;  %2250 = vmatprep.mubr.msk.f32.mxu1 %vm566_vm11, %v2791_v36 }
 0x196   :  { %2216 = vmatmul.mubr.msk.f32.gmra.mrb[30].mxu0 %vm566_vm11, %v2732_v47  ;;  %2251 = vmatmul.mubr.msk.f32.gmra.mrb[14].mxu1 %vm566_vm11, %v2805_v60  ;;  %v3025_v60 = vld [vmem:[%s3114_s3] ss:$0 sm:$0xff] }
 0x197   :  { %2218 = vmatprep.mubr.msk.f32.mxu0 %vm566_vm11, %v2753_v2  ;;  %2253 = vmatprep.mubr.msk.f32.mxu1 %vm566_vm11, %v2819_v50 }
 0x19a   :  { %2219 = vmatmul.mubr.msk.f32.gmra.mrb[32].mxu0 %vm566_vm11, %v2743_v61  ;;  %2254 = vmatmul.mubr.msk.f32.gmra.mrb[0].mxu1 %vm566_vm11, %v2822_v51 }
 0x19b   :  { %2256 = vmatprep.mubr.msk.f32.mxu1 %vm566_vm11, %v2842_v49 }
 0x19e   :  { %2257 = vmatmul.mubr.msk.f32.gmra.mrb[2].mxu1 %vm566_vm11, %v956_v34 }
 0x19f   :  { %2259 = vmatprep.mubr.msk.f32.mxu1 %vm566_vm11, %v959_v59 }
 0x1a2   :  { %2260 = vmatmul.mubr.msk.f32.gmra.mrb[4].mxu1 %vm566_vm11, %v961_v17 }
 0x1a3   :  { %2270 = vmatprep.mubr.msk.f32.mxu1 %vm566_vm11, %v2646_v43  ;;  %v3130_v43 = vld [vmem:[#allocation3_spill] sm:$0xff] }
 0x1a6   :  { %2271 = vmatmul.mubr.msk.f32.vlgmr.msra.gmra.mrb[6].mxu1 %vm566_vm11, %v2657_v53  ;;  %v3132_v53 = vld [vmem:[#allocation5_spill] sm:$0xff] }
 0x1a7   :  { %2373 = vmatpush3.bf16.msra.mxu1 %v2370_v18  ;;  %2273 = vmatprep.mubr.msk.f32.mxu1 %vm566_vm11, %v2690_v12  ;;  %v3140_v12 = vld [vmem:[#allocation13_spill] sm:$0xff] }
 0x1a8   :  { %2375 = vmatprep.subr.bf16.mxu1 %v2374_v40 }
 0x1aa   :  { %2274 = vmatmul.mubr.msk.f32.gmra.mrb[8].mxu1 %vm566_vm11, %v2693_v13  ;;  %v3141_v13 = vld [vmem:[#allocation14_spill] sm:$0xff] }
 0x1ab   :  { %2276 = vmatprep.mubr.msk.f32.mxu1 %vm566_vm11, %v2716_v25  ;;  %2377 = vmatpush3.bf16.msra.mxu1 %v2374_v40 }
 0x1ae   :  { %2277 = vmatmul.mubr.msk.f32.gmra.mrb[10].mxu1 %vm566_vm11, %v2727_v38  ;;  %v12_v38 = vstv %s3113_s6 }
 0x1af   :  { %2279 = vmatprep.mubr.msk.f32.mxu1 %vm566_vm11, %v2759_v6  ;;  %13 = vst [vmem:[#allocation2] sm:$0x1] %v12_v38 }
 0x1b2   :  { %2280 = vmatmul.mubr.msk.f32.gmra.mrb[12].mxu1 %vm566_vm11, %v2762_v10 }
 0x1b3   :  { %2282 = vmatprep.mubr.msk.f32.mxu1 %vm566_vm11, %v2794_v41 }
 0x1b6   :  { %2283 = vmatmul.mubr.msk.f32.gmra.mrb[14].mxu1 %vm566_vm11, %v2808_v62 }
 0x1b7   :  { %2285 = vmatprep.mubr.msk.f32.mxu1 %vm566_vm11, %v2826_v28  ;;  %v3031_v28 = vld [vmem:[%s3115_s4 + $0x8] sm:$0xff] }
 0x1ba   :  { %2286 = vmatmul.mubr.msk.f32.gmra.mrb[0].mxu1 %vm566_vm11, %v2829_v23 }
 0x1bb   :  { %2288 = vmatprep.mubr.msk.f32.mxu1 %vm566_vm11, %v2845_v63 }
 0x1be   :  { %2289 = vmatmul.mubr.msk.f32.gmra.mrb[2].mxu1 %vm566_vm11, %v2862_v33 }
 0x1bf   :  { %2291 = vmatprep.mubr.msk.f32.mxu1 %vm566_vm11, %v1198_v32 }
 0x1c2   :  { %2292 = vmatmul.mubr.msk.f32.gmra.mrb[4].mxu1 %vm566_vm11, %v1200_v35 }
 0x1c3   :  { %2302 = vmatprep.mubr.msk.f32.mxu1 %vm566_vm11, %v2649_v44  ;;  %v3136_v44 = vld [vmem:[#allocation9_spill] sm:$0xff] }
 0x1c6   :  { %2303 = vmatmul.mubr.msk.f32.vlgmr.msra.gmra.mrb[6].mxu1 %vm566_vm11, %v2660_v54  ;;  %v3137_v54 = vld [vmem:[#allocation10_spill] sm:$0xff] }
 0x1c7   :  { %2305 = vmatprep.mubr.msk.f32.mxu1 %vm566_vm11, %v3130_v43 }
 0x1ca   :  { %2306 = vmatmul.mubr.msk.f32.gmra.mrb[8].mxu1 %vm566_vm11, %v3131_v52 }
 0x1cb   :  { %2308 = vmatprep.mubr.msk.f32.mxu1 %vm566_vm11, %v3132_v53 }
 0x1ce   :  { %2309 = vmatmul.mubr.msk.f32.gmra.mrb[10].mxu1 %vm566_vm11, %v3133_v58 }
 0x1cf   :  { %2311 = vmatprep.mubr.msk.f32.mxu1 %vm566_vm11, %v3134_v4 }
 0x1d2   :  { %2312 = vmatmul.mubr.msk.f32.gmra.mrb[12].mxu1 %vm566_vm11, %v3135_v7 }
 0x1d3   :  { %2314 = vmatprep.mubr.msk.f32.mxu1 %vm566_vm11, %v3136_v44 }
 0x1d6   :  { %2315 = vmatmul.mubr.msk.f32.gmra.mrb[14].mxu1 %vm566_vm11, %v3137_v54 }
 0x1d7   :  { %2317 = vmatprep.mubr.msk.f32.mxu1 %vm566_vm11, %v3138_v8 }
 0x1da   :  { %2318 = vmatmul.mubr.msk.f32.gmra.mrb[0].mxu1 %vm566_vm11, %v3139_v9 }
 0x1db   :  { %2320 = vmatprep.mubr.msk.f32.mxu1 %vm566_vm11, %v3140_v12 }
 0x1de   :  { %2321 = vmatmul.mubr.msk.f32.gmra.mrb[2].mxu1 %vm566_vm11, %v3141_v13 }
 0x1df   :  { %2323 = vmatprep.mubr.msk.f32.mxu1 %vm566_vm11, %v2879_v46 }
 0x1e2   :  { %2324 = vmatmul.mubr.msk.f32.gmra.mrb[4].mxu1 %vm566_vm11, %v2882_v42 }
 0x24d   :  { %v3007_v19 = vpop.f32.mrb[34].mxu0 }
 0x24e   :  { %v3009_v22 = vpop.f32.mrb[35].mxu0 }
 0x254   :  { %v3011_v24 = vpop.f32.mrb[36].mxu0 }
 0x255   :  { %v3013_v25 = vpop.f32.mrb[37].mxu0 }
 0x259   :  { %v3015_v37 = vpop.f32.mrb[38].mxu0 }
 0x25a   :  { %v3020_v47 = vpop.f32.mrb[39].mxu0 }
 0x25d   :  { %v2208_v61 = vpop.f32.mrb[24].mxu0 }
 0x25e   :  { %v842_v0 = vpop.f32.mrb[25].mxu0 }
 0x261   :  { %v2211_v1 = vpop.f32.mrb[26].mxu0 }
 0x262   :  { %v852_v2 = vpop.f32.mrb[27].mxu0 }
 0x265   :  { %v2214_v6 = vpop.f32.mrb[28].mxu0 }
 0x266   :  { %v862_v10 = vpop.f32.mrb[29].mxu0 }
 0x269   :  { %v2217_v20 = vpop.f32.mrb[30].mxu0 }
 0x26a   :  { %v872_v21 = vpop.f32.mrb[31].mxu0 }
 0x26d   :  { %v2220_v36 = vpop.f32.mrb[32].mxu0 }
 0x26e   :  { %v882_v41 = vpop.f32.mrb[33].mxu0 }
 0x299   :  { %v2304_v56 = vpop.f32.mrb[6].mxu1 }
 0x29a   :  { %v2382_v62 = vadd.f32 %v2304_v56, %v2208_v61  ;;  %v1543_v63 = vpop.f32.mrb[7].mxu1 }
 0x29b   :  { %v2383_v50 = vadd.f32 %v1543_v63, %v842_v0 }
 0x29c   :  { %v1646_v51 = vadd.f32 %v2382_v62, %v3025_v60 }
 0x29d   :  { %v1645_v23 = vadd.f32 %v2383_v50, %v3025_v60  ;;  %v2307_v3 = vpop.f32.mrb[8].mxu1 }
 0x29e   :  { %v1662_v33 = vmax.f32 %v1646_v51, 0.0  ;;  %v2384_v49 = vadd.f32 %v2307_v3, %v2211_v1  ;;  %v1553_v34 = vpop.f32.mrb[9].mxu1 }
 0x29f   :  { %v1661_v55 = vmax.f32 %v1645_v23, 0.0  ;;  %v2385_v11 = vadd.f32 %v1553_v34, %v852_v2 }
 0x2a0   :  { %v1680_v5 = vmul.f32 %v3031_v28, %v1662_v33  ;;  %v1648_v16 = vadd.f32 %v2384_v49, %v3025_v60 }
 0x2a1   :  { %v1679_v46 = vmul.f32 %v3037_v15, %v1661_v55  ;;  %v1647_v57 = vadd.f32 %v2385_v11, %v3025_v60  ;;  %v2310_v29 = vpop.f32.mrb[10].mxu1 }
 0x2a2   :  { %v1697_v14 = vsel %vm1695_vm15, %v1680_v5, -inf  ;;  %v1664_v48 = vmax.f32 %v1648_v16, 0.0  ;;  %v2386_v26 = vadd.f32 %v2310_v29, %v2214_v6  ;;  %v1563_v45 = vpop.f32.mrb[11].mxu1 }
 0x2a3   :  { %v1696_v59 = vsel %vm1695_vm15, %v1679_v46, -inf  ;;  %v1663_v17 = vmax.f32 %v1647_v57, 0.0  ;;  %v2387_v32 = vadd.f32 %v1563_v45, %v862_v10 }
 0x2a4   :  { %v1698_v35 = vmax.f32 %v1696_v59, %v1697_v14  ;;  %v1682_v42 = vmul.f32 %v3031_v28, %v1664_v48  ;;  %v1650_v27 = vadd.f32 %v2386_v26, %v3025_v60 }
 0x2a5   :  { %v1681_v39 = vmul.f32 %v3037_v15, %v1663_v17  ;;  %v1649_v18 = vadd.f32 %v2387_v32, %v3025_v60  ;;  %v2313_v30 = vpop.f32.mrb[12].mxu1 }
 0x2a6   :  { %v1699_v31 = vrot.slane %v1698_v35, 4  ;;  %v1706_v40 = vsel %vm1695_vm15, %v1682_v42, -inf  ;;  %v1666_v43 = vmax.f32 %v1650_v27, 0.0  ;;  %v2388_v52 = vadd.f32 %v2313_v30, %v2217_v20  ;;  %v1573_v53 = vpop.f32.mrb[13].mxu1 }
 0x2a7   :  { %v1705_v58 = vsel %vm1695_vm15, %v1681_v39, -inf  ;;  %v1665_v4 = vmax.f32 %v1649_v18, 0.0  ;;  %v2389_v7 = vadd.f32 %v1573_v53, %v872_v21 }
 0x2a8   :  { %v1700_v44 = vmax.f32 %v1698_v35, %v1699_v31  ;;  %v1707_v54 = vmax.f32 %v1705_v58, %v1706_v40  ;;  %v1684_v8 = vmul.f32 %v3031_v28, %v1666_v43  ;;  %v1652_v9 = vadd.f32 %v2388_v52, %v3025_v60 }
 0x2a9   :  { %v1683_v12 = vmul.f32 %v3037_v15, %v1665_v4  ;;  %v1651_v13 = vadd.f32 %v2389_v7, %v3025_v60  ;;  %v2316_v38 = vpop.f32.mrb[14].mxu1 }
 0x2aa   :  { %v1701_v61 = vrot.slane %v1700_v44, 2  ;;  %v1708_v0 = vrot.slane %v1707_v54, 4  ;;  %v1715_v1 = vsel %vm1695_vm15, %v1684_v8, -inf  ;;  %v1668_v2 = vmax.f32 %v1652_v9, 0.0  ;;  %v1583_v6 = vpop.f32.mrb[15].mxu1 }
 0x2ab   :  { %v1714_v10 = vsel %vm1695_vm15, %v1683_v12, -inf  ;;  %v1667_v20 = vmax.f32 %v1651_v13, 0.0  ;;  %v2390_v21 = vadd.f32 %v2316_v38, %v2220_v36  ;;  %v2391_v56 = vadd.f32 %v1583_v6, %v882_v41  ;;  %v3065_v36 = vld [vmem:[%s3116_s5] ss:$0 sm:$0xff] }
 0x2ac   :  { %v1702_v62 = vmax.f32 %v1700_v44, %v1701_v61  ;;  %v1709_v63 = vmax.f32 %v1707_v54, %v1708_v0  ;;  %v1716_v50 = vmax.f32 %v1714_v10, %v1715_v1  ;;  %v1686_v51 = vmul.f32 %v3031_v28, %v1668_v2 }
 0x2ad   :  { %v1685_v23 = vmul.f32 %v3037_v15, %v1667_v20  ;;  %v1654_v3 = vadd.f32 %v2390_v21, %v3025_v60  ;;  %v1653_v33 = vadd.f32 %v2391_v56, %v3025_v60  ;;  %v2319_v49 = vpop.f32.mrb[0].mxu1 }
 0x2ae   :  { %v1703_v34 = vrot.slane %v1702_v62, 1  ;;  %v1710_v55 = vrot.slane %v1709_v63, 2  ;;  %v1717_v11 = vrot.slane %v1716_v50, 4  ;;  %v1724_v5 = vsel %vm1695_vm15, %v1686_v51, -inf  ;;  %v1593_v16 = vpop.f32.mrb[1].mxu1 }
 0x2af   :  { %v1723_v41 = vsel %vm1695_vm15, %v1685_v23, -inf  ;;  %v1670_v46 = vmax.f32 %v1654_v3, 0.0  ;;  %v1669_v57 = vmax.f32 %v1653_v33, 0.0  ;;  %v2392_v29 = vadd.f32 %v2319_v49, %v3007_v19 }
 0x2b0   :  { %v1704_v14 = vmax.f32 %v1702_v62, %v1703_v34  ;;  %v1711_v48 = vmax.f32 %v1709_v63, %v1710_v55  ;;  %v1718_v26 = vmax.f32 %v1716_v50, %v1717_v11  ;;  %v1725_v45 = vmax.f32 %v1723_v41, %v1724_v5 }
 0x2b1   :  { %v1688_v59 = vmul.f32 %v3031_v28, %v1670_v46  ;;  %v1687_v17 = vmul.f32 %v3037_v15, %v1669_v57  ;;  %v1656_v32 = vadd.f32 %v2392_v29, %v3025_v60  ;;  %v2393_v35 = vadd.f32 %v1593_v16, %v3009_v22  ;;  %v2322_v42 = vpop.f32.mrb[2].mxu1 }
 0x2b2   :  { %v1775_v27 = vmul.f32 %v3065_v36, %v1704_v14  ;;  %v1712_v39 = vrot.slane %v1711_v48, 1  ;;  %v1719_v18 = vrot.slane %v1718_v26, 2  ;;  %v1726_v30 = vrot.slane %v1725_v45, 4  ;;  %v1603_v31 = vpop.f32.mrb[3].mxu1 }
 0x2b3   :  { %v1733_v19 = vsel %vm1695_vm15, %v1688_v59, -inf  ;;  %v1732_v40 = vsel %vm1695_vm15, %v1687_v17, -inf  ;;  %v1672_v43 = vmax.f32 %v1656_v32, 0.0  ;;  %v1655_v52 = vadd.f32 %v2393_v35, %v3025_v60 }
 0x2b4   :  { %v1713_v53 = vmax.f32 %v1711_v48, %v1712_v39  ;;  %v1720_v58 = vmax.f32 %v1718_v26, %v1719_v18  ;;  %v1727_v4 = vmax.f32 %v1725_v45, %v1726_v30  ;;  %v1734_v7 = vmax.f32 %v1732_v40, %v1733_v19 }
 0x2b5   :  { %v1690_v22 = vmul.f32 %v3031_v28, %v1672_v43  ;;  %v1671_v44 = vmax.f32 %v1655_v52, 0.0  ;;  %v2394_v54 = vadd.f32 %v2322_v42, %v3011_v24  ;;  %v2395_v8 = vadd.f32 %v1603_v31, %v3013_v25  ;;  %v2325_v9 = vpop.f32.mrb[4].mxu1 }
 0x2b6   :  { %v1776_v12 = vmul.f32 %v3065_v36, %v1713_v53  ;;  %v1721_v13 = vrot.slane %v1720_v58, 1  ;;  %v1728_v38 = vrot.slane %v1727_v4, 2  ;;  %v1735_v61 = vrot.slane %v1734_v7, 4  ;;  %v1613_v0 = vpop.f32.mrb[5].mxu1 }
 0x2b7   :  { %v1742_v1 = vsel %vm1695_vm15, %v1690_v22, -inf  ;;  %v1689_v2 = vmul.f32 %v3037_v15, %v1671_v44  ;;  %v1658_v6 = vadd.f32 %v2394_v54, %v3025_v60  ;;  %v1657_v10 = vadd.f32 %v2395_v8, %v3025_v60 }
 0x2b8   :  { %v1791_v20 = vrot.slane %v1776_v12, 7  ;;  %v1722_v24 = vmax.f32 %v1720_v58, %v1721_v13  ;;  %v1729_v21 = vmax.f32 %v1727_v4, %v1728_v38  ;;  %v1736_v25 = vmax.f32 %v1734_v7, %v1735_v61 }
 0x2b9   :  { %v1741_v56 = vsel %vm1695_vm15, %v1689_v2, -inf  ;;  %v1674_v62 = vmax.f32 %v1658_v6, 0.0  ;;  %v1673_v63 = vmax.f32 %v1657_v10, 0.0  ;;  %v2396_v50 = vadd.f32 %v2325_v9, %v3015_v37 }
 0x2ba   :  { %v1777_v51 = vmul.f32 %v3065_v36, %v1722_v24  ;;  %v1730_v23 = vrot.slane %v1729_v21, 1  ;;  %v1737_v3 = vrot.slane %v1736_v25, 2  ;;  %v1743_v33 = vmax.f32 %v1741_v56, %v1742_v1 }
 0x2bb   :  { %v1692_v49 = vmul.f32 %v3031_v28, %v1674_v62  ;;  %v1691_v34 = vmul.f32 %v3037_v15, %v1673_v63  ;;  %v1660_v55 = vadd.f32 %v2396_v50, %v3025_v60  ;;  %v2397_v11 = vadd.f32 %v1613_v0, %v3020_v47  ;;  %v1983_v62 = vld [vmem:[#allocation2] ss:$0 sm:$0xff] }
 0x2bc   :  { %v1794_v5 = vrot.slane %v1777_v51, 6  ;;  %v1731_v16 = vmax.f32 %v1729_v21, %v1730_v23  ;;  %v1738_v41 = vmax.f32 %v1736_v25, %v1737_v3  ;;  %v1744_v46 = vrot.slane %v1743_v33, 4 }
 0x2bd   :  { %v1751_v57 = vsel %vm1695_vm15, %v1692_v49, -inf  ;;  %v1750_v37 = vsel %vm1695_vm15, %v1691_v34, -inf  ;;  %v1676_v29 = vmax.f32 %v1660_v55, 0.0  ;;  %v1659_v14 = vadd.f32 %v2397_v11, %v3025_v60 }
 0x2be   :  { %v1739_v48 = vrot.slane %v1738_v41, 1  ;;  %v1745_v26 = vmax.f32 %v1743_v33, %v1744_v46  ;;  %v1752_v45 = vmax.f32 %v1750_v37, %v1751_v57  ;;  %v1778_v59 = vmul.f32 %v3065_v36, %v1731_v16 }
 0x2bf   :  { %v1694_v17 = vmul.f32 %v3031_v28, %v1676_v29  ;;  %v1675_v32 = vmax.f32 %v1659_v14, 0.0  ;;  %v1793_v47 = vsel %vm1792_vm0, %v1791_v20, %v1775_v27 }
 0x2c0   :  { %v1740_v35 = vmax.f32 %v1738_v41, %v1739_v48  ;;  %v1746_v42 = vrot.slane %v1745_v26, 2  ;;  %v1753_v39 = vrot.slane %v1752_v45, 4  ;;  %v1796_v18 = vsel %vm1795_vm2, %v1794_v5, %v1793_v47 }
 0x2c1   :  { %v1760_v30 = vsel %vm1695_vm15, %v1694_v17, -inf  ;;  %v1693_v60 = vmul.f32 %v3037_v15, %v1675_v32  ;;  %v1797_v31 = vrot.slane %v1778_v59, 5 }
 0x2c2   :  { %v1747_v19 = vmax.f32 %v1745_v26, %v1746_v42  ;;  %v1754_v40 = vmax.f32 %v1752_v45, %v1753_v39  ;;  %v1779_v43 = vmul.f32 %v3065_v36, %v1740_v35 }
 0x2c3   :  { %v1759_v28 = vsel %vm1695_vm15, %v1693_v60, -inf  ;;  %v1799_v52 = vsel %vm1798_vm3, %v1797_v31, %v1796_v18 }
 0x2c4   :  { %v1748_v27 = vrot.slane %v1747_v19, 1  ;;  %v1755_v53 = vrot.slane %v1754_v40, 2  ;;  %v1761_v58 = vmax.f32 %v1759_v28, %v1760_v30  ;;  %v1800_v4 = vrot.slane %v1779_v43, 4 }
 0x2c6   :  { %v1756_v7 = vmax.f32 %v1754_v40, %v1755_v53  ;;  %v1762_v22 = vrot.slane %v1761_v58, 4  ;;  %v1749_v44 = vmax.f32 %v1747_v19, %v1748_v27  ;;  %v1802_v54 = vsel %vm1801_vm4, %v1800_v4, %v1799_v52 }
 0x2c8   :  { %v1763_v8 = vmax.f32 %v1761_v58, %v1762_v22  ;;  %v1757_v9 = vrot.slane %v1756_v7, 1  ;;  %v1780_v15 = vmul.f32 %v3065_v36, %v1749_v44 }
 0x2ca   :  { %v1764_v12 = vrot.slane %v1763_v8, 2  ;;  %v1758_v13 = vmax.f32 %v1756_v7, %v1757_v9  ;;  %v1803_v38 = vrot.slane %v1780_v15, 3 }
 0x2cc   :  { %v1765_v61 = vmax.f32 %v1763_v8, %v1764_v12  ;;  %v1781_v0 = vmul.f32 %v3065_v36, %v1758_v13  ;;  %v1805_v1 = vsel %vm1804_vm5, %v1803_v38, %v1802_v54 }
 0x2ce   :  { %v1766_v2 = vrot.slane %v1765_v61, 1  ;;  %v1806_v6 = vrot.slane %v1781_v0, 2 }
 0x2d0   :  { %v1767_v10 = vmax.f32 %v1765_v61, %v1766_v2  ;;  %v1808_v20 = vsel %vm1807_vm6, %v1806_v6, %v1805_v1 }
 0x2d2   :  { %v1782_v24 = vmul.f32 %v3065_v36, %v1767_v10 }
 0x2d4   :  { %v1809_v21 = vrot.slane %v1782_v24, 1 }
 0x2d6   :  { %v1811_v25 = vsel %vm1810_vm7, %v1809_v21, %v1808_v20 }
 0x2d7   :  { %v1813_v56 = vsel %vm1695_vm15, %v1811_v25, 0.0 }
 0x2d8   :  { %1814 = vadd.xlane.f32.xlu0 %v1813_v56 }
 0x365   :  { %v1815_v63 = vpop.xlane.xlu0 %1814 }
 0x366   :  { %v1823_v50 = vadd.f32 %v1983_v62, %v1815_v63 }
 0x368   :  { %v1984_v51 = vmul.f32 -1.442695, %v1823_v50 }
 0x36a   :  { %2447 = vpow2.f32 %v1984_v51 }
 0x374   :  { %v2448_v23 = vpop.eup %2447 }
 0x375   :  { %v1827_v3 = vadd.f32 1.0, %v2448_v23 }
 0x377   :  { %2449 = vrcp.f32 %v1827_v3 }
 0x381   :  { %v2450_v33 = vpop.eup %2449 }
 0x382   :  { %1831 = vst.msk [vmem:[%s3117_s7] sm:$0xff] %vm1830_vm8, %v2450_v33 }

</bundles_post_ra>
